<compile_context>
chip_gen: v6e
topology: v6e:2x2x1
jax: 0.10.0
libtpu: 0.0.40
codegen_flags: <defaults>
</compile_context>

<pallas_src>
import functools

import jax
import jax.numpy as jnp
from jax.experimental import pallas as pl
from jax.experimental.pallas import tpu as pltpu


def _decomp_kernel(x_ref, w_ref, b_ref, res_ref, mean_ref, *, kernels, L):
    """x_ref: (bt, L, tc) block; w_ref/b_ref: SMEM f32[n] == nn.Linear(1, n) params."""
    n = len(kernels)
    x = x_ref[...].astype(jnp.float32)
    bt, _, tc = x.shape

    fps = [(k - 1) // 2 for k in kernels]
    eps = [(k // 2) if (k % 2 == 0) else ((k - 1) // 2) for k in kernels]
    max_fp, max_ep = max(fps), max(eps)

    # --- one shared replicate-padded buffer, sliced by every kernel size.
    parts = []
    if max_fp > 0:
        parts.append(jnp.broadcast_to(x[:, 0:1, :], (bt, max_fp, tc)))
    parts.append(x)
    if max_ep > 0:
        parts.append(jnp.broadcast_to(x[:, L - 1:L, :], (bt, max_ep, tc)))
    xpad = jnp.concatenate(parts, axis=1) if len(parts) > 1 else x  # (bt, L+max_fp+max_ep, tc)

    # --- softmax max for numerical stability (cheap VALU FMAs; logits recomputed in the
    #     fused loop below to keep the number of live (bt, L, tc) temporaries small).
    m = x * w_ref[0] + b_ref[0]
    for j in range(1, n):
        m = jnp.maximum(m, x * w_ref[j] + b_ref[j])

    # --- incremental window sums over sorted kernel sizes, fused with the softmax
    #     numerators AND denominator (one exp per kernel size).  In shared-pad coordinates
    #     kernel j's window is [max_fp - fp_j, max_fp + ep_j]; larger kernels' windows are
    #     supersets of smaller ones, so each new kernel size only adds the new shifted rows.
    order = sorted(range(n), key=lambda j: kernels[j])
    lo = hi = max_fp            # currently covered window [lo, hi) in xpad coordinates
    S = None                    # running window sum
    denom = None
    mean_acc = None
    for j in order:
        k = kernels[j]
        new_lo = max_fp - fps[j]
        new_hi = max_fp + eps[j] + 1
        for off in range(new_lo, lo):
            sl = xpad[:, off:off + L, :]
            S = sl if S is None else S + sl
        for off in range(hi, new_hi):
            sl = xpad[:, off:off + L, :]
            S = sl if S is None else S + sl
        lo, hi = new_lo, new_hi
        e_j = jnp.exp(x * w_ref[j] + b_ref[j] - m)       # softmax numerator for kernel j
        denom = e_j if denom is None else denom + e_j
        term = S * (e_j * (1.0 / k))
        mean_acc = term if mean_acc is None else mean_acc + term

    # exact divide -> matches the PyTorch softmax up to normal f32 rounding
    mean = mean_acc / denom
    mean_ref[...] = mean.astype(mean_ref.dtype)
    res_ref[...] = (x - mean).astype(res_ref.dtype)


def _device_caps():
    """(cap_elems_per_block, vmem_limit_bytes, want_multi_step) per TPU generation."""
    kind = ""
    try:
        kind = jax.devices()[0].device_kind.lower()
    except Exception:
        pass
    if "v7" in kind:
        # 64 MiB physical VMEM per TC, 2 TCs per chip -> keep blocks modest, feed both cores
        return 256 * 1024, 48 * 1024 * 1024, True
    if "v6" in kind:
        # 128 MiB physical VMEM -> bigger blocks amortize per-step overhead
        return 512 * 1024, 96 * 1024 * 1024, False
    # v5e / older / unknown (incl. CPU interpret): conservative cap, explicit limit above
    # the 16 MiB scoped default
    return 128 * 1024, 48 * 1024 * 1024, False


def _choose_tiles(B, L, Cp, cap_elems, want_multi_step):
    """(batch_tile, channel_tile).  Cp is already a multiple of 128, so channel tiles are
    always lane-dense; batch rows are folded in while the block stays under the cap."""
    tc = 128
    for cand in (512, 256):
        if Cp % cand == 0 and L * cand <= cap_elems:
            tc = cand
            break
    bt = 1
    max_bt = max(1, cap_elems // max(1, L * tc))
    for d in range(min(B, max_bt), 0, -1):
        if B % d == 0:
            bt = d
            break
    # v7x: keep >= 2 grid points so both TensorCores get work.
    if want_multi_step and (B // bt) * (Cp // tc) == 1:
        if bt > 1:
            for d in range(bt // 2, 0, -1):
                if B % d == 0:
                    bt = d
                    break
        elif tc > 128 and Cp % (tc // 2) == 0:
            tc //= 2
    return bt, tc


def series_decomp_multi(x, weight, bias, kernels):
    """x: (B, L, C); weight: (n, 1), bias: (n,)  == nn.Linear(1, n) params."""
    B, L, C = x.shape
    kernels = tuple(int(k) for k in kernels)
    n = len(kernels)
    w = weight.reshape(n).astype(jnp.float32)
    b = bias.reshape(n).astype(jnp.float32)

    cap_elems, vmem_limit, multi_step = _device_caps()

    # Lane-dense channel handling: zero-pad C up to a multiple of 128 so every output
    # store is an unmasked vst.  Padded columns compute harmless zeros and are sliced off.
    Cp = ((C + 127) // 128) * 128
    xin = x if Cp == C else jnp.pad(x, ((0, 0), (0, 0), (0, Cp - C)))

    bt, tc = _choose_tiles(B, L, Cp, cap_elems, multi_step)
    grid = (B // bt, Cp // tc)
    blk = pl.BlockSpec((bt, L, tc), lambda i, j: (i, 0, j))
    kernel = functools.partial(_decomp_kernel, kernels=kernels, L=L)

    res, mean = pl.pallas_call(
        kernel,
        out_shape=(jax.ShapeDtypeStruct((B, L, Cp), x.dtype),
                   jax.ShapeDtypeStruct((B, L, Cp), x.dtype)),
        grid=grid,
        in_specs=[
            blk,
            pl.BlockSpec(memory_space=pltpu.MemorySpace.SMEM),   # w (n,)
            pl.BlockSpec(memory_space=pltpu.MemorySpace.SMEM),   # b (n,)
        ],
        out_specs=(blk, blk),
        compiler_params=pltpu.CompilerParams(
            dimension_semantics=("parallel", "parallel"),
            vmem_limit_bytes=vmem_limit),
    )(xin, w, b)

    if Cp != C:
        res = res[:, :, :C]
        mean = mean[:, :, :C]
    return res, mean


def _reference(x, weight, bias, kernels):
    """Pure-JAX mirror of the PyTorch forward, for correctness checking."""
    B, L, C = x.shape
    w = weight[:, 0]
    means = []
    for k in kernels:
        fp = (k - 1) // 2
        ep = k // 2 if (k % 2 == 0) else (k - 1) // 2
        xpad = jnp.concatenate(
            [jnp.repeat(x[:, 0:1, :], fp, axis=1), x,
             jnp.repeat(x[:, L - 1:L, :], ep, axis=1)], axis=1)
        avg = jnp.stack([xpad[:, i:i + L, :] for i in range(k)], axis=0).mean(0)
        means.append(avg)
    mm = jnp.stack(means, axis=-1)                 # (B, L, C, n)
    logits = x[..., None] * w + bias               # Linear(1, n) applied to x.unsqueeze(-1)
    wts = jax.nn.softmax(logits, axis=-1)
    mean = jnp.sum(mm * wts, axis=-1)
    return x - mean, mean


if __name__ == "__main__":
    key = jax.random.PRNGKey(0)

    def run_case(case_key, B, L, C, kernels):
        kx, kw, kb = jax.random.split(case_key, 3)
        n = len(kernels)
        x = jax.random.normal(kx, (B, L, C), dtype=jnp.float32)
        # Deterministic nn.Linear(1, n) params (fan_in=1 -> U(-1, 1) like PyTorch default).
        weight = jax.random.uniform(kw, (n, 1), minval=-1.0, maxval=1.0, dtype=jnp.float32)
        bias = jax.random.uniform(kb, (n,), minval=-1.0, maxval=1.0, dtype=jnp.float32)

        res, mean = jax.block_until_ready(series_decomp_multi(x, weight, bias, kernels))
        res_ref, mean_ref = _reference(x, weight, bias, kernels)
        assert jnp.allclose(mean, mean_ref, atol=1e-4, rtol=1e-4), "moving_mean mismatch"
        assert jnp.allclose(res, res_ref, atol=1e-4, rtol=1e-4), "res mismatch"

    k1, k2 = jax.random.split(key)
    # tiny shape, odd+even kernel sizes; C=8 is zero-padded to 128 for lane-dense stores
    run_case(k1, B=2, L=24, C=8, kernels=[3, 4, 7])
    # channel-tiled path: C=384 -> tc=128, grid=(1, 3)
    run_case(k2, B=2, L=32, C=384, kernels=[4, 8, 12])

    print("KERNEL_OK")
</pallas_src>

<mosaic_0001>
module attributes {stable_mosaic.version = 11 : i64} {
  func.func @_decomp_kernel(%arg0: i32, %arg1: i32, %arg2: memref<2x24x128xf32, #tpu.memory_space<vmem>>, %arg3: memref<3xf32, #tpu.memory_space<smem>>, %arg4: memref<3xf32, #tpu.memory_space<smem>>, %arg5: memref<2x24x128xf32, #tpu.memory_space<vmem>>, %arg6: memref<2x24x128xf32, #tpu.memory_space<vmem>>) attributes {dimension_semantics = [#tpu.dimension_semantics<parallel>, #tpu.dimension_semantics<parallel>], iteration_bounds = array<i64: 1, 1>, scalar_prefetch = 0 : i64, scratch_operands = 0 : i64, tpu.core_type = #tpu.core_type<tc>, window_params = [{transform_indices = @transform_0, window_bounds = array<i64: 2, 24, 128>}, {transform_indices = @transform_1, window_bounds = array<i64: 3>}, {transform_indices = @transform_2, window_bounds = array<i64: 3>}, {transform_indices = @transform_3, window_bounds = array<i64: 2, 24, 128>}, {transform_indices = @transform_4, window_bounds = array<i64: 2, 24, 128>}]} {
    %c0 = arith.constant 0 : index
    %c0_0 = arith.constant 0 : index
    %c0_1 = arith.constant 0 : index
    %0 = vector.load %arg2[%c0, %c0_0, %c0_1] : memref<2x24x128xf32, #tpu.memory_space<vmem>>, vector<2x24x128xf32>
    %1 = vector.extract_strided_slice %0 {offsets = [0, 0, 0], sizes = [2, 1, 128], strides = [1, 1, 1]} : vector<2x24x128xf32> to vector<2x1x128xf32>
    %2 = vector.shape_cast %1 : vector<2x1x128xf32> to vector<2x1x128xf32>
    %3 = vector.broadcast %2 : vector<2x1x128xf32> to vector<2x3x128xf32>
    %4 = vector.extract_strided_slice %0 {offsets = [0, 23, 0], sizes = [2, 1, 128], strides = [1, 1, 1]} : vector<2x24x128xf32> to vector<2x1x128xf32>
    %5 = vector.shape_cast %4 : vector<2x1x128xf32> to vector<2x1x128xf32>
    %6 = vector.broadcast %5 : vector<2x1x128xf32> to vector<2x3x128xf32>
    %7 = tpu.concatenate %3, %0, %6 in 1 : vector<2x3x128xf32>, vector<2x24x128xf32>, vector<2x3x128xf32> -> vector<2x30x128xf32>
    %c0_2 = arith.constant 0 : index
    %8 = memref.load %arg3[%c0_2] : memref<3xf32, #tpu.memory_space<smem>>
    %9 = vector.broadcast %8 : f32 to vector<2x24x128xf32>
    %10 = arith.mulf %0, %9 : vector<2x24x128xf32>
    %c0_3 = arith.constant 0 : index
    %11 = memref.load %arg4[%c0_3] : memref<3xf32, #tpu.memory_space<smem>>
    %12 = vector.broadcast %11 : f32 to vector<2x24x128xf32>
    %13 = arith.addf %10, %12 : vector<2x24x128xf32>
    %c1 = arith.constant 1 : index
    %14 = memref.load %arg3[%c1] : memref<3xf32, #tpu.memory_space<smem>>
    %15 = vector.broadcast %14 : f32 to vector<2x24x128xf32>
    %16 = arith.mulf %0, %15 : vector<2x24x128xf32>
    %c1_4 = arith.constant 1 : index
    %17 = memref.load %arg4[%c1_4] : memref<3xf32, #tpu.memory_space<smem>>
    %18 = vector.broadcast %17 : f32 to vector<2x24x128xf32>
    %19 = arith.addf %16, %18 : vector<2x24x128xf32>
    %20 = arith.maximumf %13, %19 : vector<2x24x128xf32>
    %c2 = arith.constant 2 : index
    %21 = memref.load %arg3[%c2] : memref<3xf32, #tpu.memory_space<smem>>
    %22 = vector.broadcast %21 : f32 to vector<2x24x128xf32>
    %23 = arith.mulf %0, %22 : vector<2x24x128xf32>
    %c2_5 = arith.constant 2 : index
    %24 = memref.load %arg4[%c2_5] : memref<3xf32, #tpu.memory_space<smem>>
    %25 = vector.broadcast %24 : f32 to vector<2x24x128xf32>
    %26 = arith.addf %23, %25 : vector<2x24x128xf32>
    %27 = arith.maximumf %20, %26 : vector<2x24x128xf32>
    %28 = vector.extract_strided_slice %7 {offsets = [0, 2, 0], sizes = [2, 24, 128], strides = [1, 1, 1]} : vector<2x30x128xf32> to vector<2x24x128xf32>
    %29 = vector.extract_strided_slice %7 {offsets = [0, 3, 0], sizes = [2, 24, 128], strides = [1, 1, 1]} : vector<2x30x128xf32> to vector<2x24x128xf32>
    %30 = arith.addf %28, %29 : vector<2x24x128xf32>
    %31 = vector.extract_strided_slice %7 {offsets = [0, 4, 0], sizes = [2, 24, 128], strides = [1, 1, 1]} : vector<2x30x128xf32> to vector<2x24x128xf32>
    %32 = arith.addf %30, %31 : vector<2x24x128xf32>
    %c0_6 = arith.constant 0 : index
    %33 = memref.load %arg3[%c0_6] : memref<3xf32, #tpu.memory_space<smem>>
    %34 = vector.broadcast %33 : f32 to vector<2x24x128xf32>
    %35 = arith.mulf %0, %34 : vector<2x24x128xf32>
    %c0_7 = arith.constant 0 : index
    %36 = memref.load %arg4[%c0_7] : memref<3xf32, #tpu.memory_space<smem>>
    %37 = vector.broadcast %36 : f32 to vector<2x24x128xf32>
    %38 = arith.addf %35, %37 : vector<2x24x128xf32>
    %39 = arith.subf %38, %27 : vector<2x24x128xf32>
    %40 = math.exp %39 : vector<2x24x128xf32>
    %cst = arith.constant 0.333333343 : f32
    %41 = vector.broadcast %cst : f32 to vector<2x24x128xf32>
    %42 = arith.mulf %40, %41 : vector<2x24x128xf32>
    %43 = arith.mulf %32, %42 : vector<2x24x128xf32>
    %44 = vector.extract_strided_slice %7 {offsets = [0, 5, 0], sizes = [2, 24, 128], strides = [1, 1, 1]} : vector<2x30x128xf32> to vector<2x24x128xf32>
    %45 = arith.addf %32, %44 : vector<2x24x128xf32>
    %c1_8 = arith.constant 1 : index
    %46 = memref.load %arg3[%c1_8] : memref<3xf32, #tpu.memory_space<smem>>
    %47 = vector.broadcast %46 : f32 to vector<2x24x128xf32>
    %48 = arith.mulf %0, %47 : vector<2x24x128xf32>
    %c1_9 = arith.constant 1 : index
    %49 = memref.load %arg4[%c1_9] : memref<3xf32, #tpu.memory_space<smem>>
    %50 = vector.broadcast %49 : f32 to vector<2x24x128xf32>
    %51 = arith.addf %48, %50 : vector<2x24x128xf32>
    %52 = arith.subf %51, %27 : vector<2x24x128xf32>
    %53 = math.exp %52 : vector<2x24x128xf32>
    %54 = arith.addf %40, %53 : vector<2x24x128xf32>
    %cst_10 = arith.constant 2.500000e-01 : f32
    %55 = vector.broadcast %cst_10 : f32 to vector<2x24x128xf32>
    %56 = arith.mulf %53, %55 : vector<2x24x128xf32>
    %57 = arith.mulf %45, %56 : vector<2x24x128xf32>
    %58 = arith.addf %43, %57 : vector<2x24x128xf32>
    %59 = vector.extract_strided_slice %7 {offsets = [0, 0, 0], sizes = [2, 24, 128], strides = [1, 1, 1]} : vector<2x30x128xf32> to vector<2x24x128xf32>
    %60 = arith.addf %45, %59 : vector<2x24x128xf32>
    %61 = vector.extract_strided_slice %7 {offsets = [0, 1, 0], sizes = [2, 24, 128], strides = [1, 1, 1]} : vector<2x30x128xf32> to vector<2x24x128xf32>
    %62 = arith.addf %60, %61 : vector<2x24x128xf32>
    %63 = vector.extract_strided_slice %7 {offsets = [0, 6, 0], sizes = [2, 24, 128], strides = [1, 1, 1]} : vector<2x30x128xf32> to vector<2x24x128xf32>
    %64 = arith.addf %62, %63 : vector<2x24x128xf32>
    %c2_11 = arith.constant 2 : index
    %65 = memref.load %arg3[%c2_11] : memref<3xf32, #tpu.memory_space<smem>>
    %66 = vector.broadcast %65 : f32 to vector<2x24x128xf32>
    %67 = arith.mulf %0, %66 : vector<2x24x128xf32>
    %c2_12 = arith.constant 2 : index
    %68 = memref.load %arg4[%c2_12] : memref<3xf32, #tpu.memory_space<smem>>
    %69 = vector.broadcast %68 : f32 to vector<2x24x128xf32>
    %70 = arith.addf %67, %69 : vector<2x24x128xf32>
    %71 = arith.subf %70, %27 : vector<2x24x128xf32>
    %72 = math.exp %71 : vector<2x24x128xf32>
    %73 = arith.addf %54, %72 : vector<2x24x128xf32>
    %cst_13 = arith.constant 0.142857149 : f32
    %74 = vector.broadcast %cst_13 : f32 to vector<2x24x128xf32>
    %75 = arith.mulf %72, %74 : vector<2x24x128xf32>
    %76 = arith.mulf %64, %75 : vector<2x24x128xf32>
    %77 = arith.addf %58, %76 : vector<2x24x128xf32>
    %78 = arith.divf %77, %73 : vector<2x24x128xf32>
    %c0_14 = arith.constant 0 : index
    %c0_15 = arith.constant 0 : index
    %c0_16 = arith.constant 0 : index
    %79 = vector.load %arg6[%c0_14, %c0_15, %c0_16] : memref<2x24x128xf32, #tpu.memory_space<vmem>>, vector<2x24x128xf32>
    tpu.vector_store %arg6[%c0_14, %c0_15, %c0_16], %78 {strides = array<i32>} : memref<2x24x128xf32, #tpu.memory_space<vmem>>, vector<2x24x128xf32>,
    %80 = arith.subf %0, %78 : vector<2x24x128xf32>
    %c0_17 = arith.constant 0 : index
    %c0_18 = arith.constant 0 : index
    %c0_19 = arith.constant 0 : index
    %81 = vector.load %arg5[%c0_17, %c0_18, %c0_19] : memref<2x24x128xf32, #tpu.memory_space<vmem>>, vector<2x24x128xf32>
    tpu.vector_store %arg5[%c0_17, %c0_18, %c0_19], %80 {strides = array<i32>} : memref<2x24x128xf32, #tpu.memory_space<vmem>>, vector<2x24x128xf32>,
    return
  }
  func.func @transform_0(%arg0: i32, %arg1: i32) -> (i32, i32, i32) {
    %c0_i32 = arith.constant 0 : i32
    %c0_i32_0 = arith.constant 0 : i32
    return %arg0, %c0_i32, %arg1 : i32, i32, i32
  }
  func.func @transform_1(%arg0: i32, %arg1: i32) -> i32 {
    %c0_i32 = arith.constant 0 : i32
    %c0_i32_0 = arith.constant 0 : i32
    return %c0_i32 : i32
  }
  func.func @transform_2(%arg0: i32, %arg1: i32) -> i32 {
    %c0_i32 = arith.constant 0 : i32
    %c0_i32_0 = arith.constant 0 : i32
    return %c0_i32 : i32
  }
  func.func @transform_3(%arg0: i32, %arg1: i32) -> (i32, i32, i32) {
    %c0_i32 = arith.constant 0 : i32
    %c0_i32_0 = arith.constant 0 : i32
    return %arg0, %c0_i32, %arg1 : i32, i32, i32
  }
  func.func @transform_4(%arg0: i32, %arg1: i32) -> (i32, i32, i32) {
    %c0_i32 = arith.constant 0 : i32
    %c0_i32_0 = arith.constant 0 : i32
    return %arg0, %c0_i32, %arg1 : i32, i32, i32
  }
}

</mosaic_0001>

<bundles_post_ra>
// kernel: tpu_custom_call.1
= control target key start
LH: loop header
LB: loop body
LE: loop exit
PB: predicated region body
PF: predicated region fallthrough
CT: control target
= control target key end

     0   :  { %10 = vsyncpa [#allocation3], 0  ;;  %s1312_s0 = inlined_call_operand.hbm [shape: f32[2,24,128], index: 0, kind: input, shape index: {}]   ;;  %s1313_s1 = inlined_call_operand.vmem [shape: f32[3], index: 1, kind: input, shape index: {}]   ;;  %s1314_s2 = inlined_call_operand.vmem [shape: f32[3], index: 2, kind: input, shape index: {}]   ;;  %s1315_s3 = inlined_call_operand.hbm [shape: f32[2,24,128], index: 3, kind: output, shape index: {0}]   ;;  %s1316_s4 = inlined_call_operand.hbm [shape: f32[2,24,128], index: 4, kind: output, shape index: {1}]  }
   0x1   :  { %11 = vsyncpa [#allocation5], 0 }
   0x2   :  { %12 = vsyncpa [#allocation8], 0 }
   0x3   :  { %13 = vsyncpa [#allocation4], 0 }
   0x4   :  { %14 = vsyncpa [#allocation11], 0  ;;  %s830_s15 = smov [#allocation2]   ;;  %s33_s19 = sshll.u32 %s1313_s1, 4  ;;  %s34_s19 = int_to_ptr.vmem [resolvable:$true] %s33_s19 }
   0x5   :  { %s20_s16 = sshll.u32 %s830_s15, 4  ;;  %s21_s16 = int_to_ptr.vmem [resolvable:$true] %s20_s16 }
   0x6   :  { %s744_s20 = scalar_lea.vmem %s21_s16, 768  ;;  %p749_p1 = scmp.lt.s32.totalorder %s21_s16, %s21_s16 }
   0x7   :  { %p745_p0 = scmp.ne.s32.totalorder %s21_s16, %s744_s20  ;;  %p750_p2 = scmp.lt.s32.totalorder %s744_s20, %s744_s20 }
   0x9   :  { %p751_p3 = por %p750_p2, %p749_p1 }
   0xb   :  { %p752_p4 = pnand %p751_p3, %p745_p0 }
   0xd   :  { %755 = shalt.err (!%p752_p4)
}
   0xe   :  { %s831_s21 = smov 128   ;;  %s832_s22 = smov 8  }
   0xf   :  { %26 = dma.hbm_to_vmem [thread:$0]  %s1312_s0, 768, %s21_s16, [#allocation3], %s831_s21, %s831_s21, %s832_s22  }
  0x10   :  { %s756_s25 = scalar_lea.vmem %s34_s19, 16  ;;  %p761_p6 = scmp.lt.s32.totalorder %s34_s19, %s34_s19 }
  0x11   :  { %p757_p5 = scmp.ne.s32.totalorder %s34_s19, %s756_s25  ;;  %p762_p7 = scmp.lt.s32.totalorder %s756_s25, %s756_s25 }
  0x13   :  { %p763_p8 = por %p762_p7, %p761_p6 }
  0x15   :  { %p764_p9 = pnand %p763_p8, %p757_p5 }
  0x17   :  { %767 = shalt.err (!%p764_p9)
}
  0x18   :  { %s833_s1 = smov [#allocation6]   ;;  %s43_s28 = sshll.u32 %s1314_s2, 4  ;;  %s44_s28 = int_to_ptr.vmem [resolvable:$true] %s43_s28 }
  0x19   :  { %36 = dma.vmem_to_smem %s34_s19, 16, %s833_s1, [#allocation5]  }
  0x1a   :  { %s768_s29 = scalar_lea.vmem %s44_s28, 16  ;;  %p773_p11 = scmp.lt.s32.totalorder %s44_s28, %s44_s28 }
  0x1b   :  { %p769_p10 = scmp.ne.s32.totalorder %s44_s28, %s768_s29  ;;  %p774_p12 = scmp.lt.s32.totalorder %s768_s29, %s768_s29 }
  0x1d   :  { %p775_p13 = por %p774_p12, %p773_p11 }
  0x1f   :  { %p776_p0 = pnand %p775_p13, %p769_p10 }
  0x21   :  { %779 = shalt.err (!%p776_p0)
}
  0x22   :  { %s834_s0 = smov [#allocation7]  }
  0x23   :  { %46 = dma.vmem_to_smem %s44_s28, 16, %s834_s0, [#allocation8]  }
  0x24   :  { %820 = dma.done.wait [#allocation3], 768  }
  0x25   :  { %821 = vsyncadd [#allocation3], 4294966528 }
  0x26   :  { %822 = dma.done.wait [#allocation5], 16  }
  0x27   :  { %823 = vsyncadd [#allocation5], 4294967280 }
  0x28   :  { %824 = dma.done.wait [#allocation8], 16  }
  0x29   :  { %825 = vsyncadd [#allocation8], 4294967280 }
  0x2a   :  { %56 = sfence }
  0x2b   :  { %v874_v0 = vld [vmem:[#allocation2] sm:$0xff]  ;;  %v876_v1 = vld [vmem:[#allocation2 + $0x8] sm:$0xff]  ;;  %v63_v2 = vlaneseq  ;;  %vm85_vm0 = vcmask 1042432   ;;  %s108_s2 = sld [smem:[#allocation6]]  ;;  %v882_v6 = vld [vmem:[#allocation2 + $0x10] sm:$0xff]  ;;  %vm172_vm1 = vcmask 1046528  }
  0x2c   :  { %v86_v3 = vrot.slane %v874_v0, 5  ;;  %v87_v4 = vrot.slane %v876_v1, 5  ;;  %s116_s30 = sld [smem:[#allocation7]]  ;;  %v89_v8 = vrot.slane %v882_v6, 5  ;;  %vm203_vm2 = vcmask 1045504   ;;  %s835_s9 = smov [#allocation10]  }
  0x2d   :  { %v880_v5 = vshrl.u32 %v63_v2, 7  ;;  %s673_s5 = sld [smem:[#allocation6 + $0x1]]  ;;  %vm291_vm3 = vcmask 1044480   ;;  %vm449_vm4 = vcmask 1043456   ;;  %vm418_vm5 = vcmask 1040384   ;;  %s655_s10 = sshll.u32 %s835_s9, 4  ;;  %s656_s10 = int_to_ptr.vmem [resolvable:$true] %s655_s10 }
  0x2e   :  { %v885_v7 = vsel %vm85_vm0, %v86_v3, %v87_v4  ;;  %s674_s6 = sld [smem:[#allocation7 + $0x1]]  ;;  %v893_v11 = vsel %vm85_vm0, %v87_v4, %v89_v8  ;;  %vm264_vm6 = vcmask 1041408   ;;  %s836_s11 = smov [#allocation9]  }
  0x2f   :  { %v65_v9 = vsub.s32 0, %v880_v5  ;;  %s675_s7 = sld [smem:[#allocation6 + $0x2]]  ;;  %v174_v10 = vrot.slane %v885_v7, 1  ;;  %v205_v14 = vrot.slane %v885_v7, 2  ;;  %v176_v15 = vrot.slane %v893_v11, 1  ;;  %s643_s12 = sshll.u32 %s836_s11, 4  ;;  %s644_s12 = int_to_ptr.vmem [resolvable:$true] %s643_s12 }
  0x30   :  { %s676_s8 = sld [smem:[#allocation7 + $0x2]]  ;;  %v293_v18 = vrot.slane %v885_v7, 3  ;;  %v451_v19 = vrot.slane %v885_v7, 4  ;;  %v207_v23 = vrot.slane %v893_v11, 2  ;;  %v393_v39 = vrot.slane %v885_v7, 6  ;;  %s780_s13 = scalar_lea.vmem %s656_s10, 768 }
  0x31   :  { %v66_v12 = vrot.slane %v874_v0, %v65_v9  ;;  %v898_v13 = vstv %s108_s2  ;;  %v177_v31 = vsel %vm172_vm1, %v174_v10, %v176_v15  ;;  %v295_v50 = vrot.slane %v893_v11, 3  ;;  %p781_p1 = scmp.ne.s32.totalorder %s656_s10, %s780_s13  ;;  %p785_p2 = scmp.lt.s32.totalorder %s656_s10, %s656_s10 }
  0x32   :  { %v110_v16 = vmul.f32 %v898_v13, %v874_v0  ;;  %v904_v17 = vstv %s116_s30  ;;  %v111_v22 = vmul.f32 %v898_v13, %v876_v1  ;;  %v196_v47 = vadd.f32 %v177_v31, %v885_v7  ;;  %p786_p3 = scmp.lt.s32.totalorder %s780_s13, %s780_s13 }
  0x33   :  { %v909_v20 = vsel %vm85_vm0, %v66_v12, %v86_v3  ;;  %v911_v21 = vstv %s673_s5  ;;  %v208_v49 = vsel %vm203_vm2, %v205_v14, %v207_v23  ;;  %v420_v51 = vrot.slane %v885_v7, 7 }
  0x34   :  { %v118_v24 = vadd.f32 %v904_v17, %v110_v16  ;;  %v126_v25 = vmul.f32 %v911_v21, %v874_v0  ;;  %v919_v26 = vstv %s674_s6  ;;  %v173_v27 = vrot.slane %v909_v20, 1  ;;  %p787_p4 = por %p786_p3, %p785_p2 }
  0x35   :  { %v922_v28 = vstv %s675_s7  ;;  %v204_v29 = vrot.slane %v909_v20, 2  ;;  %v292_v30 = vrot.slane %v909_v20, 3  ;;  %v450_v42 = vrot.slane %v909_v20, 4 }
  0x36   :  { %v134_v32 = vadd.f32 %v919_v26, %v126_v25  ;;  %v148_v33 = vmul.f32 %v922_v28, %v874_v0  ;;  %v932_v34 = vstv %s676_s8  ;;  %v175_v35 = vsel %vm172_vm1, %v173_v27, %v174_v10  ;;  %p788_p5 = pnand %p787_p4, %p781_p1 }
  0x37   :  { %v195_v36 = vadd.f32 %v175_v35, %v909_v20  ;;  %v206_v37 = vsel %vm203_vm2, %v204_v29, %v205_v14  ;;  %v294_v38 = vsel %vm291_vm3, %v292_v30, %v293_v18  ;;  %v119_v43 = vadd.f32 %v904_v17, %v111_v22 }
  0x38   :  { %v140_v40 = vmax.f32 %v118_v24, %v134_v32  ;;  %v156_v41 = vadd.f32 %v932_v34, %v148_v33  ;;  %v127_v45 = vmul.f32 %v911_v21, %v876_v1  ;;  %v149_v46 = vmul.f32 %v922_v28, %v876_v1 }
  0x39   :  { %v942_v44 = vadd.f32 %v206_v37, %v195_v36  ;;  %v392_v52 = vrot.slane %v909_v20, 6  ;;  %v419_v53 = vrot.slane %v909_v20, 7  ;;  %v964_v60 = vsel %vm449_vm4, %v450_v42, %v451_v19 }
  0x3a   :  { %v162_v48 = vmax.f32 %v140_v40, %v156_v41  ;;  %v135_v54 = vadd.f32 %v919_v26, %v127_v45  ;;  %v157_v55 = vadd.f32 %v932_v34, %v149_v46  ;;  %v966_v62 = vadd.f32 %v208_v49, %v196_v47 }
  0x3b   :  { %v959_v57 = vadd.f32 %v294_v38, %v942_v44  ;;  %v112_v4 = vmul.f32 %v898_v13, %v882_v6  ;;  %v296_v12 = vsel %vm291_vm3, %v293_v18, %v295_v50  ;;  %v394_v14 = vsel %vm264_vm6, %v392_v52, %v393_v39 }
  0x3c   :  { %v234_v56 = vsub.f32 %v118_v24, %v162_v48  ;;  %v322_v58 = vsub.f32 %v134_v32, %v162_v48  ;;  %v480_v59 = vsub.f32 %v156_v41, %v162_v48  ;;  %v141_v61 = vmax.f32 %v119_v43, %v135_v54 }
  0x3d   :  { %v977_v16 = vsel %vm418_vm5, %v419_v53, %v420_v51  ;;  %v410_v20 = vadd.f32 %v392_v52, %v959_v57  ;;  %v73_v22 = vsub.s32 7, %v880_v5  ;;  %v128_v24 = vmul.f32 %v911_v21, %v882_v6 }
  0x3e   :  { %v240_v63 = vmul.f32 1.442695, %v234_v56  ;;  %v328_v2 = vmul.f32 1.442695, %v322_v58  ;;  %v486_v3 = vmul.f32 1.442695, %v480_v59  ;;  %v163_v10 = vmax.f32 %v141_v61, %v157_v55 }
  0x3f   :  { %v120_v27 = vadd.f32 %v904_v17, %v112_v4  ;;  %v985_v29 = vadd.f32 %v296_v12, %v966_v62  ;;  %v74_v31 = vrot.slane %v882_v6, %v73_v22  ;;  %v136_v35 = vadd.f32 %v919_v26, %v128_v24  ;;  %v1026_v4 = vld [vmem:[#allocation2 + $0x18] sm:$0xff] }
  0x40   :  { %684 = vpow2.f32 %v240_v63  ;;  %v235_v25 = vsub.f32 %v119_v43, %v163_v10  ;;  %v323_v18 = vsub.f32 %v135_v54, %v163_v10  ;;  %v481_v30 = vsub.f32 %v157_v55, %v163_v10 }
  0x41   :  { %686 = vpow2.f32 %v328_v2  ;;  %v150_v36 = vmul.f32 %v922_v28, %v882_v6  ;;  %v441_v37 = vadd.f32 %v419_v53, %v410_v20  ;;  %v453_v38 = vrot.slane %v893_v11, 4  ;;  %v1037_v20 = vld [vmem:[#allocation2 + $0x20] sm:$0xff] }
  0x42   :  { %688 = vpow2.f32 %v486_v3  ;;  %v242_v32 = vmul.f32 1.442695, %v235_v25  ;;  %v330_v33 = vmul.f32 1.442695, %v323_v18  ;;  %v488_v40 = vmul.f32 1.442695, %v481_v30 }
  0x43   :  { %v997_v41 = vsel %vm85_vm0, %v89_v8, %v74_v31  ;;  %v142_v42 = vmax.f32 %v120_v27, %v136_v35  ;;  %v158_v43 = vadd.f32 %v932_v34, %v150_v36  ;;  %v395_v48 = vrot.slane %v893_v11, 6 }
  0x44   :  { %690 = vpow2.f32 %v242_v32  ;;  %v178_v45 = vrot.slane %v997_v41, 1  ;;  %v209_v46 = vrot.slane %v997_v41, 2  ;;  %v297_v47 = vrot.slane %v997_v41, 3 }
  0x45   :  { %692 = vpow2.f32 %v330_v33  ;;  %v164_v49 = vmax.f32 %v142_v42, %v158_v43  ;;  %v422_v52 = vrot.slane %v893_v11, 7  ;;  %v411_v53 = vadd.f32 %v394_v14, %v985_v29 }
  0x46   :  { %694 = vpow2.f32 %v488_v40  ;;  %v179_v8 = vsel %vm172_vm1, %v176_v15, %v178_v45  ;;  %v1012_v54 = vsel %vm449_vm4, %v451_v19, %v453_v38  ;;  %v210_v56 = vsel %vm203_vm2, %v207_v23, %v209_v46 }
  0x47   :  { %v197_v55 = vadd.f32 %v179_v8, %v893_v11  ;;  %v236_v58 = vsub.f32 %v120_v27, %v164_v49  ;;  %v298_v59 = vsel %vm291_vm3, %v295_v50, %v297_v47  ;;  %v324_v61 = vsub.f32 %v136_v35, %v164_v49 }
  0x48   :  { %v482_v15 = vsub.f32 %v158_v43, %v164_v49  ;;  %v396_v2 = vsel %vm264_vm6, %v393_v39, %v395_v48  ;;  %v455_v19 = vrot.slane %v997_v41, 4  ;;  %v198_v3 = vadd.f32 %v178_v45, %v997_v41 }
  0x49   :  { %v1019_v63 = vadd.f32 %v210_v56, %v197_v55  ;;  %v244_v11 = vmul.f32 1.442695, %v236_v58  ;;  %v332_v10 = vmul.f32 1.442695, %v324_v61  ;;  %v423_v23 = vsel %vm418_vm5, %v420_v51, %v422_v52 }
  0x4a   :  { %v490_v50 = vmul.f32 1.442695, %v482_v15  ;;  %v1034_v14 = vadd.f32 %v209_v46, %v198_v3  ;;  %v424_v39 = vrot.slane %v997_v41, 7  ;;  %v70_v24 = vrot.slane %v1026_v4, %v65_v9 }
  0x4b   :  { %v1032_v12 = vadd.f32 %v298_v59, %v1019_v63  ;;  %696 = vpow2.f32 %v244_v11  ;;  %v91_v7 = vrot.slane %v1026_v4, 5  ;;  %v92_v51 = vrot.slane %v1037_v20, 5 }
  0x4c   :  { %v113_v18 = vmul.f32 %v898_v13, %v1026_v4  ;;  %698 = vpow2.f32 %v332_v10  ;;  %v1048_v32 = vadd.f32 %v297_v47, %v1034_v14  ;;  %v129_v36 = vmul.f32 %v911_v21, %v1026_v4 }
  0x4d   :  { %v685_v25 = vpop.eup %684  ;;  %v412_v31 = vadd.f32 %v396_v2, %v1032_v12  ;;  %700 = vpow2.f32 %v490_v50  ;;  %v472_v42 = vadd.f32 %v964_v60, %v441_v37  ;;  %v442_v45 = vadd.f32 %v977_v16, %v411_v53 }
  0x4e   :  { %v687_v27 = vpop.eup %686  ;;  %v252_v30 = vmul.f32 0.33333334, %v685_v25  ;;  %v456_v47 = vsel %vm449_vm4, %v453_v38, %v455_v19  ;;  %v425_v8 = vsel %vm418_vm5, %v422_v52, %v424_v39  ;;  %v413_v58 = vadd.f32 %v395_v48, %v1048_v32 }
  0x4f   :  { %v689_v33 = vpop.eup %688  ;;  %v340_v35 = vadd.f32 %v687_v27, %v685_v25  ;;  %v346_v9 = vmul.f32 0.25, %v687_v27  ;;  %v443_v56 = vadd.f32 %v423_v23, %v412_v31  ;;  %v1062_v59 = vsel %vm85_vm0, %v91_v7, %v92_v51 }
  0x50   :  { %v265_v40 = vrot.slane %v252_v30, 6  ;;  %v504_v43 = vmul.f32 0.14285715, %v689_v33  ;;  %v1065_v60 = vadd.f32 %v904_v17, %v113_v18  ;;  %v1068_v61 = vsel %vm85_vm0, %v70_v24, %v91_v7 }
  0x51   :  { %v358_v46 = vrot.slane %v346_v9, 6  ;;  %v498_v49 = vadd.f32 %v689_v33, %v340_v35  ;;  %v691_v55 = vpop.eup %690  ;;  %v1071_v38 = vadd.f32 %v919_v26, %v129_v36  ;;  %v151_v25 = vmul.f32 %v922_v28, %v1026_v4 }
  0x52   :  { %v693_v16 = vpop.eup %692  ;;  %v253_v53 = vmul.f32 0.33333334, %v691_v55  ;;  %v283_v48 = vmul.f32 %v265_v40, %v942_v44  ;;  %v516_v15 = vrot.slane %v504_v43, 6  ;;  %v473_v44 = vadd.f32 %v1012_v54, %v442_v45 }
  0x53   :  { %v556_v37 = vrot.slane %v498_v49, 6  ;;  %v695_v52 = vpop.eup %694  ;;  %v341_v2 = vadd.f32 %v693_v16, %v691_v55  ;;  %v347_v3 = vmul.f32 0.25, %v693_v16  ;;  %v376_v11 = vmul.f32 %v358_v46, %v959_v57 }
  0x54   :  { %v266_v10 = vrot.slane %v253_v53, 6  ;;  %v505_v23 = vmul.f32 0.14285715, %v695_v52  ;;  %v143_v24 = vmax.f32 %v1065_v60, %v1071_v38  ;;  %v474_v27 = vadd.f32 %v456_v47, %v443_v56 }
  0x55   :  { %702 = vrcp.f32 %v556_v37  ;;  %v359_v50 = vrot.slane %v347_v3, 6  ;;  %v499_v39 = vadd.f32 %v695_v52, %v341_v2  ;;  %v1083_v31 = vadd.f32 %v932_v34, %v151_v25 }
  0x56   :  { %v267_v7 = vsel %vm264_vm6, %v265_v40, %v266_v10  ;;  %v517_v18 = vrot.slane %v505_v23, 6  ;;  %v180_v33 = vrot.slane %v1068_v61, 1  ;;  %v384_v35 = vadd.f32 %v376_v11, %v283_v48 }
  0x57   :  { %v360_v30 = vsel %vm264_vm6, %v358_v46, %v359_v50  ;;  %v557_v57 = vrot.slane %v499_v39, 6  ;;  %v534_v9 = vmul.f32 %v516_v15, %v472_v42  ;;  %v444_v36 = vadd.f32 %v425_v8, %v413_v58 }
  0x58   :  { %v181_v43 = vrot.slane %v1062_v59, 1  ;;  %v697_v49 = vpop.eup %696  ;;  %v284_v40 = vmul.f32 %v267_v7, %v966_v62  ;;  %v377_v54 = vmul.f32 %v360_v30, %v985_v29  ;;  %v165_v46 = vmax.f32 %v143_v24, %v1083_v31 }
  0x59   :  { %v558_v45 = vsel %vm264_vm6, %v556_v37, %v557_v57  ;;  %v699_v47 = vpop.eup %698  ;;  %v518_v55 = vsel %vm264_vm6, %v516_v15, %v517_v18  ;;  %v254_v56 = vmul.f32 0.33333334, %v697_v49  ;;  %v211_v16 = vrot.slane %v1068_v61, 2 }
  0x5a   :  { %704 = vrcp.f32 %v558_v45  ;;  %v701_v42 = vpop.eup %700  ;;  %v342_v8 = vadd.f32 %v699_v47, %v697_v49  ;;  %v348_v58 = vmul.f32 0.25, %v699_v47  ;;  %v182_v62 = vsel %vm172_vm1, %v180_v33, %v181_v43 }
  0x5b   :  { %v212_v29 = vrot.slane %v1062_v59, 2  ;;  %v268_v53 = vrot.slane %v254_v56, 6  ;;  %v506_v37 = vmul.f32 0.14285715, %v701_v42  ;;  %v475_v52 = vadd.f32 %v455_v19, %v444_v36  ;;  %v1124_v56 = vld [vmem:[#allocation2 + $0x28] sm:$0xff] }
  0x5c   :  { %v237_v48 = vsub.f32 %v1065_v60, %v165_v46  ;;  %v542_v15 = vadd.f32 %v534_v9, %v384_v35  ;;  %v535_v2 = vmul.f32 %v518_v55, %v473_v44  ;;  %v361_v3 = vrot.slane %v348_v58, 6 }
  0x5d   :  { %v500_v11 = vadd.f32 %v701_v42, %v342_v8  ;;  %v385_v23 = vadd.f32 %v377_v54, %v284_v40  ;;  %v269_v39 = vsel %vm264_vm6, %v266_v10, %v268_v53  ;;  %v519_v24 = vrot.slane %v506_v37, 6 }
  0x5e   :  { %v199_v25 = vadd.f32 %v182_v62, %v1068_v61  ;;  %v362_v7 = vsel %vm264_vm6, %v359_v50, %v361_v3  ;;  %v213_v41 = vsel %vm203_vm2, %v211_v16, %v212_v29  ;;  %v299_v19 = vrot.slane %v1068_v61, 3 }
  0x5f   :  { %v559_v30 = vrot.slane %v500_v11, 6  ;;  %v285_v60 = vmul.f32 %v269_v39, %v1019_v63  ;;  %v286_v44 = vmul.f32 %v268_v53, %v1034_v14  ;;  %v379_v33 = vmul.f32 %v361_v3, %v1048_v32 }
  0x60   :  { %v246_v35 = vmul.f32 1.442695, %v237_v48  ;;  %v378_v9 = vmul.f32 %v362_v7, %v1032_v12  ;;  %v520_v36 = vsel %vm264_vm6, %v517_v18, %v519_v24  ;;  %v300_v40 = vrot.slane %v1062_v59, 3 }
  0x61   :  { %v560_v50 = vsel %vm264_vm6, %v557_v57, %v559_v30  ;;  %706 = vrcp.f32 %v559_v30  ;;  %v543_v54 = vadd.f32 %v535_v2, %v385_v23  ;;  %v1116_v63 = vadd.f32 %v213_v41, %v199_v25 }
  0x62   :  { %v703_v10 = vpop.eup %702  ;;  %708 = vrcp.f32 %v560_v50  ;;  %v325_v14 = vsub.f32 %v1071_v38, %v165_v46  ;;  %v536_v32 = vmul.f32 %v520_v36, %v474_v27  ;;  %v537_v45 = vmul.f32 %v519_v24, %v475_v52 }
  0x63   :  { %v1113_v49 = vmul.f32 %v703_v10, %v542_v15  ;;  %710 = vpow2.f32 %v246_v35  ;;  %v301_v12 = vsel %vm291_vm3, %v299_v19, %v300_v40  ;;  %v386_v18 = vadd.f32 %v378_v9, %v285_v60 }
  0x64   :  { %v387_v57 = vadd.f32 %v379_v33, %v286_v44  ;;  %v334_v47 = vmul.f32 1.442695, %v325_v14  ;;  %v483_v55 = vsub.f32 %v1083_v31, %v165_v46  ;;  %v94_v16 = vrot.slane %v1124_v56, 5 }
  0x65   :  { %590 = vst [vmem:[#allocation10 - $0x2] sm:$0xfc] %v1113_v49  ;;  %v114_v38 = vmul.f32 %v898_v13, %v1037_v20  ;;  %v130_v27 = vmul.f32 %v911_v21, %v1037_v20  ;;  %v152_v42 = vmul.f32 %v922_v28, %v1037_v20  ;;  %v1134_v58 = vadd.f32 %v301_v12, %v1116_v63 }
  0x66   :  { %712 = vpow2.f32 %v334_v47  ;;  %v397_v31 = vrot.slane %v1068_v61, 6  ;;  %v492_v46 = vmul.f32 1.442695, %v483_v55  ;;  %v1142_v53 = vsel %vm85_vm0, %v92_v51, %v94_v16 }
  0x67   :  { %v705_v8 = vpop.eup %704  ;;  %v122_v37 = vadd.f32 %v904_v17, %v114_v38  ;;  %v138_v52 = vadd.f32 %v919_v26, %v130_v27  ;;  %v160_v48 = vadd.f32 %v932_v34, %v152_v42  ;;  %v183_v15 = vrot.slane %v1142_v53, 1 }
  0x68   :  { %v1137_v62 = vmul.f32 %v705_v8, %v543_v54  ;;  %714 = vpow2.f32 %v492_v46  ;;  %v545_v2 = vadd.f32 %v537_v45, %v387_v57  ;;  %v457_v11 = vrot.slane %v1068_v61, 4 }
  0x69   :  { %v144_v3 = vmax.f32 %v122_v37, %v138_v52  ;;  %v458_v23 = vrot.slane %v1062_v59, 4  ;;  %v184_v51 = vsel %vm172_vm1, %v181_v43, %v183_v15  ;;  %v214_v39 = vrot.slane %v1142_v53, 2 }
  0x6a   :  { %591 = vst [vmem:[#allocation10 + $0x6] sm:$0xff] %v1137_v62  ;;  %v544_v24 = vadd.f32 %v536_v32, %v386_v18  ;;  %v414_v25 = vadd.f32 %v397_v31, %v1134_v58  ;;  %v426_v7 = vrot.slane %v1068_v61, 7  ;;  %v78_v41 = vrot.slane %v1124_v56, %v73_v22 }
  0x6b   :  { %v166_v30 = vmax.f32 %v144_v3, %v160_v48  ;;  %v606_v60 = vrot.slane %v1113_v49, 2  ;;  %v200_v44 = vadd.f32 %v184_v51, %v1062_v59  ;;  %v459_v9 = vsel %vm449_vm4, %v457_v11, %v458_v23 }
  0x6c   :  { %v215_v5 = vsel %vm203_vm2, %v212_v29, %v214_v39  ;;  %v445_v50 = vadd.f32 %v426_v7, %v414_v25  ;;  %v302_v14 = vrot.slane %v1142_v53, 3  ;;  %v1181_v18 = vsel %vm85_vm0, %v94_v16, %v78_v41 }
  0x6d   :  { %v238_v43 = vsub.f32 %v122_v37, %v166_v30  ;;  %v326_v33 = vsub.f32 %v138_v52, %v166_v30  ;;  %v484_v22 = vsub.f32 %v160_v48, %v166_v30  ;;  %v115_v57 = vmul.f32 %v898_v13, %v1124_v56 }
  0x6e   :  { %v707_v19 = vpop.eup %706  ;;  %v1188_v47 = vadd.f32 %v215_v5, %v200_v44  ;;  %v398_v55 = vrot.slane %v1062_v59, 6  ;;  %v131_v27 = vmul.f32 %v911_v21, %v1124_v56  ;;  %v153_v16 = vmul.f32 %v922_v28, %v1124_v56 }
  0x6f   :  { %v709_v35 = vpop.eup %708  ;;  %v1166_v10 = vmul.f32 %v707_v19, %v545_v2  ;;  %v248_v54 = vmul.f32 1.442695, %v238_v43  ;;  %v336_v45 = vmul.f32 1.442695, %v326_v33  ;;  %v494_v12 = vmul.f32 1.442695, %v484_v22 }
  0x70   :  { %v1176_v36 = vmul.f32 %v709_v35, %v544_v24  ;;  %v711_v32 = vpop.eup %710  ;;  %v123_v38 = vadd.f32 %v904_v17, %v115_v57  ;;  %v303_v13 = vsel %vm291_vm3, %v300_v40, %v302_v14  ;;  %v427_v8 = vrot.slane %v1062_v59, 7 }
  0x71   :  { %593 = vst [vmem:[#allocation10 + $0x16] sm:$0x3] %v1166_v10  ;;  %v1186_v29 = vmul.f32 0.33333334, %v711_v32  ;;  %716 = vpow2.f32 %v248_v54  ;;  %v185_v46 = vrot.slane %v1181_v18, 1  ;;  %v139_v17 = vadd.f32 %v919_v26, %v131_v27 }
  0x72   :  { %592 = vst [vmem:[#allocation10 + $0xe] sm:$0xff] %v1176_v36  ;;  %718 = vpow2.f32 %v336_v45  ;;  %v161_v21 = vadd.f32 %v932_v34, %v153_v16  ;;  %v607_v28 = vrot.slane %v1137_v62, 2  ;;  %v476_v3 = vadd.f32 %v459_v9, %v445_v50 }
  0x73   :  { %v713_v42 = vpop.eup %712  ;;  %720 = vpow2.f32 %v494_v12  ;;  %v270_v2 = vrot.slane %v1186_v29, 6  ;;  %v460_v40 = vrot.slane %v1142_v53, 4  ;;  %v1211_v51 = vadd.f32 %v303_v13, %v1188_v47 }
  0x74   :  { %v343_v37 = vadd.f32 %v713_v42, %v711_v32  ;;  %v1201_v52 = vmul.f32 0.25, %v713_v42  ;;  %v399_v26 = vsel %vm264_vm6, %v397_v31, %v398_v55  ;;  %v145_v34 = vmax.f32 %v123_v38, %v139_v17 }
  0x75   :  { %v715_v48 = vpop.eup %714  ;;  %v428_v62 = vsel %vm418_vm5, %v426_v7, %v427_v8  ;;  %v186_v25 = vsel %vm172_vm1, %v183_v15, %v185_v46  ;;  %v216_v30 = vrot.slane %v1181_v18, 2  ;;  %v304_v31 = vrot.slane %v1181_v18, 3 }
  0x76   :  { %v1208_v11 = vadd.f32 %v715_v48, %v343_v37  ;;  %v363_v24 = vrot.slane %v1201_v52, 6  ;;  %v1226_v41 = vmul.f32 0.14285715, %v715_v48  ;;  %v167_v61 = vmax.f32 %v145_v34, %v161_v21 }
  0x77   :  { %v609_v44 = vrot.slane %v1176_v36, 2  ;;  %v611_v43 = vrot.slane %v1166_v10, 2  ;;  %v287_v7 = vmul.f32 %v270_v2, %v1116_v63  ;;  %v461_v15 = vsel %vm449_vm4, %v458_v23, %v460_v40 }
  0x78   :  { %v561_v19 = vrot.slane %v1208_v11, 6  ;;  %v415_v33 = vadd.f32 %v399_v26, %v1211_v51  ;;  %v201_v35 = vadd.f32 %v186_v25, %v1142_v53  ;;  %v239_v9 = vsub.f32 %v123_v38, %v167_v61 }
  0x79   :  { %v380_v5 = vmul.f32 %v363_v24, %v1134_v58  ;;  %v217_v10 = vsel %vm203_vm2, %v214_v39, %v216_v30  ;;  %v327_v22 = vsub.f32 %v139_v17, %v167_v61  ;;  %v485_v63 = vsub.f32 %v161_v21, %v167_v61 }
  0x7a   :  { %722 = vrcp.f32 %v561_v19  ;;  %v521_v36 = vrot.slane %v1226_v41, 6  ;;  %v250_v50 = vmul.f32 1.442695, %v239_v9  ;;  %v305_v54 = vsel %vm291_vm3, %v302_v14, %v304_v31 }
  0x7b   :  { %v202_v23 = vadd.f32 %v185_v46, %v1181_v18  ;;  %v338_v32 = vmul.f32 1.442695, %v327_v22  ;;  %v400_v45 = vrot.slane %v1142_v53, 6  ;;  %v496_v12 = vmul.f32 1.442695, %v485_v63 }
  0x7c   :  { %v608_v58 = vsel %vm203_vm2, %v606_v60, %v607_v28  ;;  %v1253_v38 = vadd.f32 %v217_v10, %v201_v35  ;;  %724 = vpow2.f32 %v250_v50  ;;  %v388_v14 = vadd.f32 %v380_v5, %v287_v7 }
  0x7d   :  { %v1255_v39 = vadd.f32 %v216_v30, %v202_v23  ;;  %v626_v27 = vsub.f32 %v874_v0, %v608_v58  ;;  %726 = vpow2.f32 %v338_v32  ;;  %v610_v13 = vsel %vm203_vm2, %v607_v28, %v609_v44 }
  0x7e   :  { %v717_v57 = vpop.eup %716  ;;  %v538_v37 = vmul.f32 %v521_v36, %v476_v3  ;;  %728 = vpow2.f32 %v496_v12  ;;  %v446_v17 = vadd.f32 %v428_v62, %v415_v33  ;;  %v627_v48 = vsub.f32 %v876_v1, %v610_v13 }
  0x7f   :  { %v719_v16 = vpop.eup %718  ;;  %v1258_v42 = vmul.f32 0.33333334, %v717_v57  ;;  %632 = vst [vmem:[#allocation9] sm:$0xff] %v626_v27  ;;  %v321_v26 = vadd.f32 %v304_v31, %v1255_v39  ;;  %v612_v34 = vsel %vm203_vm2, %v609_v44, %v611_v43  ;;  %v320_v28 = vadd.f32 %v305_v54, %v1253_v38 }
  0x80   :  { %v721_v46 = vpop.eup %720  ;;  %v344_v49 = vadd.f32 %v719_v16, %v717_v57  ;;  %v350_v52 = vmul.f32 0.25, %v719_v16  ;;  %v429_v3 = vrot.slane %v1142_v53, 7  ;;  %v431_v25 = vrot.slane %v1181_v18, 7  ;;  %633 = vst [vmem:[#allocation9 + $0x8] sm:$0xff] %v627_v48 }
  0x81   :  { %v271_v60 = vrot.slane %v1258_v42, 6  ;;  %v508_v21 = vmul.f32 0.14285715, %v721_v46  ;;  %v628_v30 = vsub.f32 %v882_v6, %v612_v34  ;;  %v546_v41 = vadd.f32 %v538_v37, %v388_v14 }
  0x82   :  { %v364_v0 = vrot.slane %v350_v52, 6  ;;  %v502_v11 = vadd.f32 %v721_v46, %v344_v49  ;;  %v401_v1 = vsel %vm264_vm6, %v398_v55, %v400_v45  ;;  %v477_v43 = vadd.f32 %v461_v15, %v446_v17 }
  0x83   :  { %v272_v61 = vsel %vm264_vm6, %v270_v2, %v271_v60  ;;  %v522_v44 = vrot.slane %v508_v21, 6  ;;  %634 = vst [vmem:[#allocation9 + $0x10] sm:$0xff] %v628_v30  ;;  %v417_v33 = vadd.f32 %v400_v45, %v321_v26  ;;  %v416_v6 = vadd.f32 %v401_v1, %v320_v28 }
  0x84   :  { %v562_v62 = vrot.slane %v502_v11, 6  ;;  %v365_v31 = vsel %vm264_vm6, %v363_v24, %v364_v0  ;;  %v430_v9 = vsel %vm418_vm5, %v427_v8, %v429_v3  ;;  %v432_v55 = vsel %vm418_vm5, %v429_v3, %v431_v25 }
  0x85   :  { %v288_v2 = vmul.f32 %v272_v61, %v1188_v47  ;;  %v381_v24 = vmul.f32 %v365_v31, %v1211_v51  ;;  %v462_v5 = vrot.slane %v1181_v18, 4  ;;  %v523_v15 = vsel %vm264_vm6, %v521_v36, %v522_v44 }
  0x86   :  { %v563_v7 = vsel %vm264_vm6, %v561_v19, %v562_v62  ;;  %v448_v19 = vadd.f32 %v432_v55, %v417_v33  ;;  %v447_v22 = vadd.f32 %v430_v9, %v416_v6  ;;  %v539_v59 = vmul.f32 %v523_v15, %v477_v43 }
  0x87   :  { %v723_v35 = vpop.eup %722  ;;  %730 = vrcp.f32 %v563_v7  ;;  %v389_v50 = vadd.f32 %v381_v24, %v288_v2  ;;  %v463_v8 = vsel %vm449_vm4, %v460_v40, %v462_v5 }
  0x88   :  { %v583_v29 = vmul.f32 %v723_v35, %v546_v41  ;;  %v479_v18 = vadd.f32 %v462_v5, %v448_v19  ;;  %v478_v36 = vadd.f32 %v463_v8, %v447_v22 }
  0x89   :  { %v725_v10 = vpop.eup %724  ;;  %v547_v57 = vadd.f32 %v539_v59, %v389_v50 }
  0x8a   :  { %594 = vst [vmem:[#allocation10 + $0x16] sm:$0xfc] %v583_v29  ;;  %v727_v63 = vpop.eup %726  ;;  %v257_v54 = vmul.f32 0.33333334, %v725_v10  ;;  %v613_v11 = vrot.slane %v583_v29, 2 }
  0x8b   :  { %v729_v23 = vpop.eup %728  ;;  %v345_v47 = vadd.f32 %v727_v63, %v725_v10  ;;  %v351_v32 = vmul.f32 0.25, %v727_v63 }
  0x8c   :  { %v273_v51 = vrot.slane %v257_v54, 6  ;;  %v509_v45 = vmul.f32 0.14285715, %v729_v23 }
  0x8d   :  { %v366_v12 = vrot.slane %v351_v32, 6  ;;  %v503_v58 = vadd.f32 %v729_v23, %v345_v47 }
  0x8e   :  { %v274_v27 = vsel %vm264_vm6, %v271_v60, %v273_v51  ;;  %v524_v16 = vrot.slane %v509_v45, 6  ;;  %v290_v14 = vmul.f32 %v273_v51, %v1255_v39 }
  0x8f   :  { %v289_v42 = vmul.f32 %v274_v27, %v1253_v38  ;;  %v367_v53 = vsel %vm264_vm6, %v364_v0, %v366_v12  ;;  %v564_v40 = vrot.slane %v503_v58, 6  ;;  %v383_v13 = vmul.f32 %v366_v12, %v321_v26 }
  0x90   :  { %v382_v46 = vmul.f32 %v367_v53, %v320_v28  ;;  %v525_v37 = vsel %vm264_vm6, %v522_v44, %v524_v16  ;;  %v541_v49 = vmul.f32 %v524_v16, %v479_v18 }
  0x91   :  { %v540_v52 = vmul.f32 %v525_v37, %v478_v36  ;;  %v565_v17 = vsel %vm264_vm6, %v562_v62, %v564_v40  ;;  %v391_v21 = vadd.f32 %v383_v13, %v290_v14  ;;  %732 = vrcp.f32 %v564_v40 }
  0x92   :  { %v390_v60 = vadd.f32 %v382_v46, %v289_v42  ;;  %734 = vrcp.f32 %v565_v17 }
  0x93   :  { %v549_v34 = vadd.f32 %v541_v49, %v391_v21 }
  0x94   :  { %v731_v48 = vpop.eup %730  ;;  %v548_v38 = vadd.f32 %v540_v52, %v390_v60 }
  0x95   :  { %v585_v39 = vmul.f32 %v731_v48, %v547_v57 }
  0x97   :  { %595 = vst [vmem:[#allocation10 + $0x1e] sm:$0xff] %v585_v39  ;;  %v614_v0 = vrot.slane %v585_v39, 2 }
  0x99   :  { %v615_v26 = vsel %vm203_vm2, %v613_v11, %v614_v0 }
  0x9a   :  { %v629_v28 = vsub.f32 %v1026_v4, %v615_v26 }
  0x9c   :  { %635 = vst [vmem:[#allocation9 + $0x18] sm:$0xff] %v629_v28 }
  0x9e   :  { %v733_v3 = vpop.eup %732 }
  0x9f   :  { %v735_v25 = vpop.eup %734  ;;  %v589_v30 = vmul.f32 %v733_v3, %v549_v34 }
  0xa0   :  { %v587_v41 = vmul.f32 %v735_v25, %v548_v38 }
  0xa1   :  { %597 = vst [vmem:[#allocation10 + $0x2e] sm:$0x3] %v589_v30  ;;  %v618_v62 = vrot.slane %v589_v30, 2 }
  0xa2   :  { %596 = vst [vmem:[#allocation10 + $0x26] sm:$0xff] %v587_v41  ;;  %v616_v1 = vrot.slane %v587_v41, 2 }
  0xa3   :  { %791 = shalt.err (!%p788_p5)
}
  0xa4   :  { %661 = dma.vmem_to_hbm [thread:$0]  %s656_s10, 768, %s1316_s4, [#allocation11], %s831_s21, %s831_s21, %s832_s22   ;;  %v617_v4 = vsel %vm203_vm2, %v614_v0, %v616_v1  ;;  %v619_v61 = vsel %vm203_vm2, %v616_v1, %v618_v62 }
  0xa5   :  { %v630_v31 = vsub.f32 %v1037_v20, %v617_v4  ;;  %v631_v44 = vsub.f32 %v1124_v56, %v619_v61  ;;  %s800_s16 = scalar_lea.vmem %s644_s12, 768  ;;  %p805_p7 = scmp.lt.s32.totalorder %s644_s12, %s644_s12 }
  0xa6   :  { %p801_p6 = scmp.ne.s32.totalorder %s644_s12, %s800_s16  ;;  %p806_p8 = scmp.lt.s32.totalorder %s800_s16, %s800_s16 }
  0xa7   :  { %636 = vst [vmem:[#allocation9 + $0x20] sm:$0xff] %v630_v31  ;;  %637 = vst [vmem:[#allocation9 + $0x28] sm:$0xff] %v631_v44 }
  0xa8   :  { %p807_p9 = por %p806_p8, %p805_p7 }
  0xaa   :  { %p808_p10 = pnand %p807_p9, %p801_p6 }
  0xac   :  { %811 = shalt.err (!%p808_p10)
}
  0xad   :  { %649 = dma.vmem_to_hbm [thread:$0]  %s644_s12, 768, %s1315_s3, [#allocation4], %s831_s21, %s831_s21, %s832_s22  }
  0xae   :  { %826 = dma.done.wait [#allocation4], 768  }
  0xaf   :  { %827 = vsyncadd [#allocation4], 4294966528 }
  0xb0   :  { %828 = dma.done.wait [#allocation11], 768  }
  0xb1   :  { %829 = vsyncadd [#allocation11], 4294966528 }
  0xb2   :  { %668 = vsyncpa [#allocation3], 1 }
  0xb3   :  { %669 = vsyncpa [#allocation4], 1 }
  0xb4   :  { %670 = vsyncpa [#allocation11], 1 }
  0xb5   :  { %671 = vsyncpa [#allocation5], 1 }
  0xb6   :  { %672 = vsyncpa [#allocation8], 1 }

</bundles_post_ra>
